<compile_context>
chip_gen: v7x
topology: tpu7x:2x2x1
jax: 0.10.0
libtpu: 0.0.40
codegen_flags: <defaults>
</compile_context>

<pallas_src>
import functools

import numpy as np

import jax
import jax.numpy as jnp
from jax.experimental import pallas as pl
from jax.experimental.pallas import tpu as pltpu


def _round_up(x, n):
  return (x + n - 1) // n * n


def _slab_offsets(qs):
  """Row offsets (all multiples of 8) of each section in the 128-lane weight slab."""
  off, r = {}, 0
  off["w2"] = r; r += qs          # conv2 dense weight      (qs, 128)
  off["b2"] = r; r += 8           # conv2 bias row          (1, 128)
  off["w3"] = r; r += 128         # conv3 dense weight      (128, 128)
  off["b3"] = r; r += 8           # conv3 bias row
  off["wh"] = r; r += 128         # fused actor|critic hidden weight (128, 128)
  off["bh"] = r; r += 8           # hidden bias row
  off["wo"] = r; r += 128         # block-diagonal output weight (128, 128)
  off["bo"] = r; r += 8           # output bias row
  off["total"] = r
  return off


# ------------------------------- fused kernel --------------------------------

def _fused_forward_kernel(x_ref, w1_ref, ws_ref, out_ref, *, num_actions, qs, off):
  f32 = jnp.float32
  x = x_ref[...]                                               # (TB, kin_pad)

  # conv1 + ReLU (bias comes from the ones input column), quadrant-major lanes.
  y1 = jnp.maximum(jnp.dot(x, w1_ref[...], preferred_element_type=f32), 0.0)

  # 2x2 stride-2 max-pool = elementwise max of the four 256-lane quadrant slabs.
  pooled = jnp.maximum(jnp.maximum(y1[:, 0:qs],          y1[:, qs:2 * qs]),
                       jnp.maximum(y1[:, 2 * qs:3 * qs], y1[:, 3 * qs:4 * qs]))

  def lin(v, w_off, w_rows, b_off):
    w = ws_ref[w_off:w_off + w_rows, :]                        # static 8-aligned slices
    b = ws_ref[b_off:b_off + 1, :]
    return jnp.dot(v, w, preferred_element_type=f32) + b

  y2  = jnp.maximum(lin(pooled, off["w2"], qs, off["b2"]), 0.0)   # conv2 + ReLU -> (TB,128)
  emb = jnp.maximum(lin(y2, off["w3"], 128, off["b3"]), 0.0)      # conv3 + ReLU -> (TB,128)
  h   = jnp.tanh(lin(emb, off["wh"], 128, off["bh"]))             # actor|critic hidden
  o   = lin(h, off["wo"], 128, off["bo"])                         # logits | value

  # Masked log-softmax over the actor lanes; lane A keeps the critic value.
  lane = jax.lax.broadcasted_iota(jnp.int32, o.shape, 1)
  amask = lane < num_actions
  logits = jnp.where(amask, o, f32(-1e30))
  z = logits - jnp.max(logits, axis=1, keepdims=True)
  se = jnp.sum(jnp.where(amask, jnp.exp(z), 0.0), axis=1, keepdims=True)
  logp = z - jnp.log(se)
  out_ref[...] = jnp.where(amask, logp,
                           jnp.where(lane == num_actions, o, 0.0)).astype(out_ref.dtype)


# --------------------------------- wrapper -----------------------------------

def model_free_ac_forward(packed, image, num_actions, block_b=128):
  """image: (B, H, W, 3) float32 (the layout PyTorch receives before its NCHW transpose).

  Returns (log_probs (B, A), value (B,), memory=None).
  """
  # TODO(synk): recurrent MultiLayerCustomLSTM / text GRU branches (recurrent=True,
  # use_text=True) are not implemented; module defaults are False.
  B, H, W, Cin = image.shape
  assert Cin == 3 and num_actions < 128 and block_b % 8 == 0
  Hp, Wp = (H - 1) // 2, (W - 1) // 2
  qs = _round_up(Hp * Wp * 16, 128)
  off = _slab_offsets(qs)
  kin = H * W * Cin + 1
  kin_pad = _round_up(kin, 8)
  assert packed["w1"].shape == (kin_pad, 4 * qs)
  assert packed["ws"].shape == (off["total"], 128)

  # Lane-dense flattened input + ones column (conv1 bias) + pad to a multiple of 8 lanes.
  x = image.reshape(B, H * W * Cin)
  x = jnp.concatenate(
      [x, jnp.ones((B, 1), x.dtype), jnp.zeros((B, kin_pad - kin), x.dtype)], axis=1)

  tb = min(block_b, _round_up(B, 8))
  bp = _round_up(B, tb)
  if bp != B:
    x = jnp.pad(x, ((0, bp - B), (0, 0)))

  slab = pl.pallas_call(
      functools.partial(_fused_forward_kernel, num_actions=num_actions, qs=qs, off=off),
      out_shape=jax.ShapeDtypeStruct((bp, 128), jnp.float32),
      grid=(bp // tb,),
      in_specs=[pl.BlockSpec((tb, kin_pad), lambda b: (b, 0)),
                pl.BlockSpec(packed["w1"].shape, lambda b: (0, 0)),
                pl.BlockSpec(packed["ws"].shape, lambda b: (0, 0))],
      out_specs=pl.BlockSpec((tb, 128), lambda b: (b, 0)),
      compiler_params=pltpu.CompilerParams(dimension_semantics=("parallel",)),
  )(x, packed["w1"], packed["ws"])

  return slab[:B, :num_actions], slab[:B, num_actions], None


# ------------------------ parameter init & host packing ----------------------

def init_model_params(key, num_actions, embedding_size=64):
  ks = jax.random.split(key, 10)

  def conv_w(k, kh, kw, cin, cout):
    bound = 1.0 / jnp.sqrt(jnp.float32(kh * kw * cin))
    return jax.random.uniform(k, (kh, kw, cin, cout), jnp.float32, -bound, bound)

  def conv_b(k, fan_in, cout):
    bound = 1.0 / jnp.sqrt(jnp.float32(fan_in))
    return jax.random.uniform(k, (1, cout), jnp.float32, -bound, bound)

  def lin_w(k, in_dim, out_dim):
    # Mirrors init_params: N(0,1) rows of torch (out,in) weight, row-normalized,
    # stored transposed as (in, out) for the x @ W layout.
    w = jax.random.normal(k, (out_dim, in_dim), jnp.float32)
    w = w / jnp.sqrt(jnp.sum(w * w, axis=1, keepdims=True))
    return jnp.transpose(w)

  zeros = lambda d: jnp.zeros((1, d), jnp.float32)

  return {
      "conv1_w": conv_w(ks[0], 2, 2, 3, 16),   "conv1_b": conv_b(ks[1], 12, 16),
      "conv2_w": conv_w(ks[2], 2, 2, 16, 32),  "conv2_b": conv_b(ks[3], 64, 32),
      "conv3_w": conv_w(ks[4], 2, 2, 32, 64),  "conv3_b": conv_b(ks[5], 128, 64),
      "actor_w1":  lin_w(ks[6], embedding_size, 64), "actor_b1":  zeros(64),
      "actor_w2":  lin_w(ks[7], 64, num_actions),    "actor_b2":  zeros(num_actions),
      "critic_w1": lin_w(ks[8], embedding_size, 64), "critic_b1": zeros(64),
      "critic_w2": lin_w(ks[9], 64, 1),              "critic_b2": zeros(1),
  }


def pack_params(params, num_actions, H, W):
  """One-time host-side packing into the fused kernel's dense-matmul layout."""
  Cin = 3
  Hp, Wp = (H - 1) // 2, (W - 1) // 2          # pooled grid (floor, matches MaxPool2d)
  Hc2, Wc2 = Hp - 1, Wp - 1                    # conv2 output grid
  Hout, Wout = Hc2 - 1, Wc2 - 1                # conv3 output grid
  assert Hout >= 1 and Wout >= 1
  hw3 = Hout * Wout
  E = hw3 * 64                                 # image embedding size
  n2 = Hc2 * Wc2 * 32                          # conv2 flattened feature count
  A = num_actions
  qs = _round_up(Hp * Wp * 16, 128)            # pool-quadrant lane stride (128-aligned)
  # TODO(synk): observation grids larger than ~8x8 need a wider (>128 lane) weight slab.
  assert n2 <= 128 and E <= 128 and A < 128
  assert params["actor_w1"].shape[0] == E

  w1 = np.asarray(params["conv1_w"], np.float32)
  b1 = np.asarray(params["conv1_b"], np.float32).reshape(-1)
  w2 = np.asarray(params["conv2_w"], np.float32)
  b2 = np.asarray(params["conv2_b"], np.float32).reshape(-1)
  w3 = np.asarray(params["conv3_w"], np.float32)
  b3 = np.asarray(params["conv3_b"], np.float32).reshape(-1)

  # conv1 as a dense matmul from the flattened channels-last image (+ ones bias column)
  # to a pool-quadrant-major layout: lane = q*qs + (pi*Wp + pj)*16 + c where
  # (oi, oj) = (2*pi + di, 2*pj + dj) and q = 2*di + dj.  Padding lanes stay zero.
  kin = H * W * Cin + 1
  kin_pad = _round_up(kin, 8)
  w1d = np.zeros((kin_pad, 4 * qs), np.float32)
  for oi in range(2 * Hp):
    for oj in range(2 * Wp):
      q = 2 * (oi % 2) + (oj % 2)
      lane0 = q * qs + ((oi // 2) * Wp + (oj // 2)) * 16
      for ki in range(2):
        for kj in range(2):
          row0 = ((oi + ki) * W + (oj + kj)) * Cin
          w1d[row0:row0 + Cin, lane0:lane0 + 16] += w1[ki, kj]
      w1d[kin - 1, lane0:lane0 + 16] += b1       # bias via the ones input column

  off = _slab_offsets(qs)
  ws = np.zeros((off["total"], 128), np.float32)

  # conv2: pooled (pi*Wp + pj)*16 + c  ->  (oi2*Wc2 + oj2)*32 + c2.
  for oi2 in range(Hc2):
    for oj2 in range(Wc2):
      g0 = (oi2 * Wc2 + oj2) * 32
      for ki in range(2):
        for kj in range(2):
          f0 = ((oi2 + ki) * Wp + (oj2 + kj)) * 16
          ws[off["w2"] + f0:off["w2"] + f0 + 16, g0:g0 + 32] += w2[ki, kj]
  ws[off["b2"], :n2] = np.tile(b2, Hc2 * Wc2)

  # conv3: conv2 flat -> NCHW-flattened embedding e = c3*hw3 + (oi3*Wout + oj3).
  for oi3 in range(Hout):
    for oj3 in range(Wout):
      s3 = oi3 * Wout + oj3
      for ki in range(2):
        for kj in range(2):
          g0 = ((oi3 + ki) * Wc2 + (oj3 + kj)) * 32
          ws[off["w3"] + g0:off["w3"] + g0 + 32, s3:E:hw3] += w3[ki, kj]
  ws[off["b3"], :E] = np.repeat(b3, hw3)

  # Fused actor|critic hidden layer: lanes [0,64) actor, [64,128) critic.
  ws[off["wh"]:off["wh"] + E, 0:64] = np.asarray(params["actor_w1"], np.float32)
  ws[off["wh"]:off["wh"] + E, 64:128] = np.asarray(params["critic_w1"], np.float32)
  ws[off["bh"], 0:64] = np.asarray(params["actor_b1"], np.float32).reshape(-1)
  ws[off["bh"], 64:128] = np.asarray(params["critic_b1"], np.float32).reshape(-1)

  # Block-diagonal output: lanes [0,A) = actor logits, lane A = critic value.
  ws[off["wo"]:off["wo"] + 64, 0:A] = np.asarray(params["actor_w2"], np.float32)
  ws[off["wo"] + 64:off["wo"] + 128, A] = np.asarray(params["critic_w2"], np.float32)[:, 0]
  ws[off["bo"], 0:A] = np.asarray(params["actor_b2"], np.float32).reshape(-1)
  ws[off["bo"], A] = np.asarray(params["critic_b2"], np.float32).reshape(-1)[0]

  return {"w1": jnp.asarray(w1d), "ws": jnp.asarray(ws)}


# ------------------------ pure-JAX reference (no Pallas) ----------------------

def reference_forward(params, image):
  hi = jax.lax.Precision.HIGHEST

  def conv(x, w, b):
    B, H, W, Cin = x.shape
    cout = w.shape[-1]
    Ho, Wo = H - 1, W - 1
    patches = jnp.concatenate(
        [x[:, di:di + Ho, dj:dj + Wo, :] for di in range(2) for dj in range(2)],
        axis=-1).reshape(B * Ho * Wo, 4 * Cin)
    y = jnp.dot(patches, w.reshape(4 * Cin, cout), precision=hi) + b
    return jnp.maximum(y, 0.0).reshape(B, Ho, Wo, cout)

  x = conv(image, params["conv1_w"], params["conv1_b"])
  B, Hc, Wc, C = x.shape
  Hp, Wp = Hc // 2, Wc // 2
  x = x[:, :2 * Hp, :2 * Wp, :].reshape(B, Hp, 2, Wp, 2, C).max(axis=(2, 4))
  x = conv(x, params["conv2_w"], params["conv2_b"])
  x = conv(x, params["conv3_w"], params["conv3_b"])
  emb = jnp.transpose(x, (0, 3, 1, 2)).reshape(B, -1)          # NCHW flatten like PyTorch

  def head(w1, b1, w2, b2):
    h = jnp.tanh(jnp.dot(emb, w1, precision=hi) + b1)
    return jnp.dot(h, w2, precision=hi) + b2

  logits = head(params["actor_w1"], params["actor_b1"],
                params["actor_w2"], params["actor_b2"])
  value = head(params["critic_w1"], params["critic_b1"],
               params["critic_w2"], params["critic_b2"])[:, 0]
  return jax.nn.log_softmax(logits, axis=-1), value


# ----------------------------------- main -------------------------------------

if __name__ == "__main__":
  key = jax.random.PRNGKey(0)
  pkey, xkey = jax.random.split(key)

  batch, n, m, num_actions = 64, 7, 7, 7          # MiniGrid-like 7x7x3 obs, 7 actions
  embedding_size = ((n - 1) // 2 - 2) * ((m - 1) // 2 - 2) * 64   # = 64

  params = init_model_params(pkey, num_actions, embedding_size=embedding_size)
  packed = pack_params(params, num_actions, n, m)
  image = jax.random.normal(xkey, (batch, n, m, 3), dtype=jnp.float32)

  # block_b=16 -> 4 grid steps here (multiple of 2, >=4 steps); use 128-256 for
  # production RL batch sizes so each matmul has M=128/256.
  fwd = jax.jit(functools.partial(model_free_ac_forward,
                                  num_actions=num_actions, block_b=16))
  log_probs, value, memory = fwd(packed, image)
  log_probs, value = jax.block_until_ready((log_probs, value))

  ref_logp, ref_value = reference_forward(params, image)

  assert log_probs.shape == (batch, num_actions), log_probs.shape
  assert value.shape == (batch,), value.shape
  assert memory is None
  # Categorical log-probs must normalize, and everything must be finite.
  assert bool(jnp.all(jnp.abs(jnp.sum(jnp.exp(log_probs), axis=1) - 1.0) < 1e-4))
  assert bool(jnp.all(jnp.isfinite(log_probs))) and bool(jnp.all(jnp.isfinite(value)))
  # Kernel matmuls use the MXU's default (reduced-precision) f32 path; compare against
  # the precision=HIGHEST reference with a correspondingly loose tolerance.
  assert bool(jnp.allclose(log_probs, ref_logp, atol=5e-2, rtol=5e-2)), \
      (log_probs, ref_logp)
  assert bool(jnp.allclose(value, ref_value, atol=5e-2, rtol=5e-2)), (value, ref_value)

  print("KERNEL_OK")
</pallas_src>

<mosaic_0001>
module attributes {stable_mosaic.version = 11 : i64} {
  func.func @_fused_forward_kernel(%arg0: i32, %arg1: memref<16x152xf32, #tpu.memory_space<vmem>>, %arg2: memref<152x1024xf32, #tpu.memory_space<vmem>>, %arg3: memref<672x128xf32, #tpu.memory_space<vmem>>, %arg4: memref<16x128xf32, #tpu.memory_space<vmem>>) attributes {dimension_semantics = [#tpu.dimension_semantics<parallel>], iteration_bounds = array<i64: 4>, scalar_prefetch = 0 : i64, scratch_operands = 0 : i64, tpu.core_type = #tpu.core_type<tc>, window_params = [{transform_indices = @transform_0, window_bounds = array<i64: 16, 152>}, {pipeline_mode = #tpu.pipeline_mode<synchronous>, transform_indices = @transform_1, window_bounds = array<i64: 152, 1024>}, {pipeline_mode = #tpu.pipeline_mode<synchronous>, transform_indices = @transform_2, window_bounds = array<i64: 672, 128>}, {transform_indices = @transform_3, window_bounds = array<i64: 16, 128>}]} {
    %c0 = arith.constant 0 : index
    %c0_0 = arith.constant 0 : index
    %0 = vector.load %arg1[%c0, %c0_0] : memref<16x152xf32, #tpu.memory_space<vmem>>, vector<16x152xf32>
    %c0_1 = arith.constant 0 : index
    %c0_2 = arith.constant 0 : index
    %1 = vector.load %arg2[%c0_1, %c0_2] : memref<152x1024xf32, #tpu.memory_space<vmem>>, vector<152x1024xf32>
    %cst = arith.constant dense<0.000000e+00> : vector<16x1024xf32>
    %2 = tpu.matmul %0, %1, %cst {dimension_numbers = #tpu.dot_dimension_numbers<[1], [0], [0], [1], [0, 0, 1, 1], [], []>} : vector<16x152xf32>, vector<152x1024xf32>, vector<16x1024xf32> -> vector<16x1024xf32>
    %cst_3 = arith.constant 0.000000e+00 : f32
    %3 = vector.broadcast %cst_3 : f32 to vector<16x1024xf32>
    %4 = arith.maximumf %2, %3 : vector<16x1024xf32>
    %5 = vector.extract_strided_slice %4 {offsets = [0, 0], sizes = [16, 256], strides = [1, 1]} : vector<16x1024xf32> to vector<16x256xf32>
    %6 = vector.extract_strided_slice %4 {offsets = [0, 256], sizes = [16, 256], strides = [1, 1]} : vector<16x1024xf32> to vector<16x256xf32>
    %7 = arith.maximumf %5, %6 : vector<16x256xf32>
    %8 = vector.extract_strided_slice %4 {offsets = [0, 512], sizes = [16, 256], strides = [1, 1]} : vector<16x1024xf32> to vector<16x256xf32>
    %9 = vector.extract_strided_slice %4 {offsets = [0, 768], sizes = [16, 256], strides = [1, 1]} : vector<16x1024xf32> to vector<16x256xf32>
    %10 = arith.maximumf %8, %9 : vector<16x256xf32>
    %11 = arith.maximumf %7, %10 : vector<16x256xf32>
    %c0_4 = arith.constant 0 : index
    %c0_5 = arith.constant 0 : index
    %12 = vector.load %arg3[%c0_4, %c0_5] : memref<672x128xf32, #tpu.memory_space<vmem>>, vector<256x128xf32>
    %c256 = arith.constant 256 : index
    %c0_6 = arith.constant 0 : index
    %13 = vector.load %arg3[%c256, %c0_6] : memref<672x128xf32, #tpu.memory_space<vmem>>, vector<1x128xf32>
    %cst_7 = arith.constant dense<0.000000e+00> : vector<16x128xf32>
    %14 = tpu.matmul %11, %12, %cst_7 {dimension_numbers = #tpu.dot_dimension_numbers<[1], [0], [0], [1], [0, 0, 1, 1], [], []>} : vector<16x256xf32>, vector<256x128xf32>, vector<16x128xf32> -> vector<16x128xf32>
    %15 = vector.broadcast %13 : vector<1x128xf32> to vector<16x128xf32>
    %16 = arith.addf %14, %15 : vector<16x128xf32>
    %cst_8 = arith.constant 0.000000e+00 : f32
    %17 = vector.broadcast %cst_8 : f32 to vector<16x128xf32>
    %18 = arith.maximumf %16, %17 : vector<16x128xf32>
    %c264 = arith.constant 264 : index
    %c0_9 = arith.constant 0 : index
    %19 = vector.load %arg3[%c264, %c0_9] : memref<672x128xf32, #tpu.memory_space<vmem>>, vector<128x128xf32>
    %c392 = arith.constant 392 : index
    %c0_10 = arith.constant 0 : index
    %20 = vector.load %arg3[%c392, %c0_10] : memref<672x128xf32, #tpu.memory_space<vmem>>, vector<1x128xf32>
    %cst_11 = arith.constant dense<0.000000e+00> : vector<16x128xf32>
    %21 = tpu.matmul %18, %19, %cst_11 {dimension_numbers = #tpu.dot_dimension_numbers<[1], [0], [0], [1], [0, 0, 1, 1], [], []>} : vector<16x128xf32>, vector<128x128xf32>, vector<16x128xf32> -> vector<16x128xf32>
    %22 = vector.broadcast %20 : vector<1x128xf32> to vector<16x128xf32>
    %23 = arith.addf %21, %22 : vector<16x128xf32>
    %cst_12 = arith.constant 0.000000e+00 : f32
    %24 = vector.broadcast %cst_12 : f32 to vector<16x128xf32>
    %25 = arith.maximumf %23, %24 : vector<16x128xf32>
    %c400 = arith.constant 400 : index
    %c0_13 = arith.constant 0 : index
    %26 = vector.load %arg3[%c400, %c0_13] : memref<672x128xf32, #tpu.memory_space<vmem>>, vector<128x128xf32>
    %c528 = arith.constant 528 : index
    %c0_14 = arith.constant 0 : index
    %27 = vector.load %arg3[%c528, %c0_14] : memref<672x128xf32, #tpu.memory_space<vmem>>, vector<1x128xf32>
    %cst_15 = arith.constant dense<0.000000e+00> : vector<16x128xf32>
    %28 = tpu.matmul %25, %26, %cst_15 {dimension_numbers = #tpu.dot_dimension_numbers<[1], [0], [0], [1], [0, 0, 1, 1], [], []>} : vector<16x128xf32>, vector<128x128xf32>, vector<16x128xf32> -> vector<16x128xf32>
    %29 = vector.broadcast %27 : vector<1x128xf32> to vector<16x128xf32>
    %30 = arith.addf %28, %29 : vector<16x128xf32>
    %31 = math.tanh %30 : vector<16x128xf32>
    %c536 = arith.constant 536 : index
    %c0_16 = arith.constant 0 : index
    %32 = vector.load %arg3[%c536, %c0_16] : memref<672x128xf32, #tpu.memory_space<vmem>>, vector<128x128xf32>
    %c664 = arith.constant 664 : index
    %c0_17 = arith.constant 0 : index
    %33 = vector.load %arg3[%c664, %c0_17] : memref<672x128xf32, #tpu.memory_space<vmem>>, vector<1x128xf32>
    %cst_18 = arith.constant dense<0.000000e+00> : vector<16x128xf32>
    %34 = tpu.matmul %31, %32, %cst_18 {dimension_numbers = #tpu.dot_dimension_numbers<[1], [0], [0], [1], [0, 0, 1, 1], [], []>} : vector<16x128xf32>, vector<128x128xf32>, vector<16x128xf32> -> vector<16x128xf32>
    %35 = vector.broadcast %33 : vector<1x128xf32> to vector<16x128xf32>
    %36 = arith.addf %34, %35 : vector<16x128xf32>
    %37 = tpu.iota {dimensions = array<i32: 1>} : vector<16x128xi32>
    %c7_i32 = arith.constant 7 : i32
    %38 = vector.broadcast %c7_i32 : i32 to vector<16x128xi32>
    %39 = arith.cmpi slt, %37, %38 : vector<16x128xi32>
    %cst_19 = arith.constant -1.000000e+30 : f32
    %40 = vector.broadcast %cst_19 : f32 to vector<16x128xf32>
    %41 = arith.select %39, %36, %40 : vector<16x128xi1>, vector<16x128xf32>
    %cst_20 = arith.constant dense<0xFF800000> : vector<16xf32>
    %42 = vector.multi_reduction <maximumf>, %41, %cst_20 [1] : vector<16x128xf32> to vector<16xf32>
    %43 = vector.shape_cast %42 : vector<16xf32> to vector<16x1xf32>
    %44 = vector.broadcast %43 : vector<16x1xf32> to vector<16x128xf32>
    %45 = arith.subf %41, %44 : vector<16x128xf32>
    %46 = math.exp %45 : vector<16x128xf32>
    %cst_21 = arith.constant 0.000000e+00 : f32
    %47 = vector.broadcast %cst_21 : f32 to vector<16x128xf32>
    %48 = arith.select %39, %46, %47 : vector<16x128xi1>, vector<16x128xf32>
    %cst_22 = arith.constant dense<0.000000e+00> : vector<16xf32>
    %49 = vector.multi_reduction <add>, %48, %cst_22 [1] : vector<16x128xf32> to vector<16xf32>
    %50 = vector.shape_cast %49 : vector<16xf32> to vector<16x1xf32>
    %51 = math.log %50 : vector<16x1xf32>
    %52 = vector.broadcast %51 : vector<16x1xf32> to vector<16x128xf32>
    %53 = arith.subf %45, %52 : vector<16x128xf32>
    %c7_i32_23 = arith.constant 7 : i32
    %54 = vector.broadcast %c7_i32_23 : i32 to vector<16x128xi32>
    %55 = arith.cmpi eq, %37, %54 : vector<16x128xi32>
    %cst_24 = arith.constant 0.000000e+00 : f32
    %56 = vector.broadcast %cst_24 : f32 to vector<16x128xf32>
    %57 = arith.select %55, %36, %56 : vector<16x128xi1>, vector<16x128xf32>
    %58 = arith.select %39, %53, %57 : vector<16x128xi1>, vector<16x128xf32>
    %c0_25 = arith.constant 0 : index
    %c0_26 = arith.constant 0 : index
    %59 = vector.load %arg4[%c0_25, %c0_26] : memref<16x128xf32, #tpu.memory_space<vmem>>, vector<16x128xf32>
    tpu.vector_store %arg4[%c0_25, %c0_26], %58 {strides = array<i32>} : memref<16x128xf32, #tpu.memory_space<vmem>>, vector<16x128xf32>,
    return
  }
  func.func @transform_0(%arg0: i32) -> (i32, i32) {
    %c0_i32 = arith.constant 0 : i32
    %c0_i32_0 = arith.constant 0 : i32
    return %arg0, %c0_i32 : i32, i32
  }
  func.func @transform_1(%arg0: i32) -> (i32, i32) {
    %c0_i32 = arith.constant 0 : i32
    %c0_i32_0 = arith.constant 0 : i32
    %c0_i32_1 = arith.constant 0 : i32
    return %c0_i32, %c0_i32_0 : i32, i32
  }
  func.func @transform_2(%arg0: i32) -> (i32, i32) {
    %c0_i32 = arith.constant 0 : i32
    %c0_i32_0 = arith.constant 0 : i32
    %c0_i32_1 = arith.constant 0 : i32
    return %c0_i32, %c0_i32_0 : i32, i32
  }
  func.func @transform_3(%arg0: i32) -> (i32, i32) {
    %c0_i32 = arith.constant 0 : i32
    %c0_i32_0 = arith.constant 0 : i32
    return %arg0, %c0_i32 : i32, i32
  }
}

</mosaic_0001>

<bundles_post_ra>
// kernel: model_free_ac_forward.1
= control target key start
LH: loop header
LB: loop body
LE: loop exit
PB: predicated region body
PF: predicated region fallthrough
CT: control target
= control target key end

     0   :  { %8 = vsyncpa [#allocation3], 0  ;;  %s1791_s12 = smov 0   ;;  %s2360_s0 = inlined_call_operand.vmem [shape: f32[64,152], index: 0, kind: input, shape index: {}]   ;;  %s2361_s1 = inlined_call_operand.vmem [shape: f32[152,1024], index: 1, kind: input, shape index: {}]   ;;  %s2362_s2 = inlined_call_operand.hbm [shape: f32[672,128], index: 2, kind: input, shape index: {}]   ;;  %s2363_s3 = inlined_call_operand.vmem [shape: f32[64,128], index: 3, kind: output, shape index: {}]  }
   0x1 LB: > { %s1199_s13 = sadd.s32 4294967295, %s1766_s12   ;;  %p1201_p0 = scmp.ge.s32.totalorder %s1766_s12, 1  ;;  %s1766_s12 = sphi %s1791_s12, %s14_s12  }
   0x2   : > { %p113_p1 = scmp.lt.s32.totalorder %s1766_s12, 5  ;;  %s1768_s14 = smov [#allocation2]  }
   0x3   : > { %s128_s15 = sshll.u32 %s1768_s14, 4  ;;  %p1805_p3 = scmp.eq.s32.totalorder %s1199_s13, 0  ;;  %s129_s15 = int_to_ptr.vmem [resolvable:$true] %s128_s15 }
   0x4   : > { %p1799_p2 = pnand %p1201_p0, %p113_p1  ;;  %s1728_s21 = scalar_lea.hbm %s2362_s2, 10752 }
   0x5   : > { %s2368_s17 = scalar_select %p1805_p3, 1, 0 }
   0x6   : > { %s2367_s16 = scalar_select %p1799_p2, 1, 0 }
   0x7   : > { %p1699_p4 = pneg %p1799_p2  ;;  %p1729_p6 = scmp.ne.s32.totalorder %s2362_s2, %s1728_s21 }
   0x8   : > { %p1735_p10 = scmp.lt.u32.totalorder %s1728_s21, %s2362_s2 }
   0x9   : > { %p1813_p5 = pnand %p1805_p3, %p1699_p4 }
   0xb   : > { %p1730_p7 = pneg %p1813_p5 }
   0xd   : > { %p1731_p8 = pnand %p1730_p7, %p1729_p6 }
   0xf   : > { %p1732_p9 = pneg %p1731_p8 }
  0x11   : > { %p1737_p11 = pnand %p1735_p10, %p1732_p9 }
  0x13   : > { %1740 = shalt.err (!%p1737_p11)
}
  0x14   : > { %s1741_s26 = scalar_lea.vmem %s129_s15, 10752  ;;  %p1749_p1 = scmp.lt.s32.totalorder %s129_s15, %s129_s15 }
  0x15   : > { %p1742_p12 = scmp.ne.s32.totalorder %s129_s15, %s1741_s26  ;;  %p1750_p4 = scmp.lt.s32.totalorder %s1741_s26, %s1741_s26 }
  0x17   : > { %p1744_p13 = pnand %p1742_p12, %p1730_p7  ;;  %p1751_p3 = por %p1750_p4, %p1749_p1 }
  0x19   : > { %p1745_p0 = pneg %p1744_p13 }
  0x1b   : > { %p1752_p2 = pnand %p1751_p3, %p1745_p0 }
  0x1d   : > { %1755 = shalt.err (!%p1752_p2)
}
  0x1e   : > { %s1769_s27 = smov 128   ;;  %s1770_s28 = smov 8  }
  0x1f   : > { %1702 = dma.hbm_to_vmem [thread:$0]  (!%p1813_p5), %s2362_s2, 10752, %s129_s15, [#allocation3], %s1769_s27, %s1769_s27, %s1770_s28  }
  0x20   : > { %p2370_p6 = scmp.ne.s32.totalorder %s2367_s16, 0 }
  0x21   : > { %p2371_p8 = scmp.ne.s32.totalorder (!%p2370_p6), %s2368_s17, 0 }
  0x22   : > { %154 = sbr.rel (%p2370_p6) target bundleno = 1549 (0x60d), region = 32 }
  0x29   : > { %1761 = dma.done.wait (%p2371_p8), [#allocation3], 10752  }
  0x2a   : > { %1763 = vsyncadd (%p2371_p8), [#allocation3], 4294956544  ;;  %v197_v0 = vld [vmem:[%s2361_s1 + $0x8] sm:$0xff]  ;;  %v199_v2 = vld [vmem:[%s2361_s1 + $0x18] sm:$0xff]  ;;  %s1922_s8 = sshll.u32 %s1199_s13, 1  ;;  %vm348_vm0 = vcmask 195584  }
  0x2b   : > { %v205_v1 = vld [vmem:[%s2361_s1 + $0x48] sm:$0xff]  ;;  %v207_v4 = vld [vmem:[%s2361_s1 + $0x58] sm:$0xff]  ;;  %v196_v5 = vld [vmem:[%s2361_s1] sm:$0xff]  ;;  %p180_p2 = scmp.lt.s32.totalorder %s1922_s8, 7 }
  0x2c   : > { %v1423_v3 = vpack.c.bf16 %v205_v1, %v197_v0  ;;  %v204_v6 = vld [vmem:[%s2361_s1 + $0x40] sm:$0xff]  ;;  %v1459_v7 = vpack.c.bf16 %v207_v4, %v199_v2  ;;  %v198_v9 = vld [vmem:[%s2361_s1 + $0x10] sm:$0xff]  ;;  %v213_v11 = vld [vmem:[%s2361_s1 + $0x88] sm:$0xff] }
  0x2d   : > { %v1425_v8 = vpack.c.bf16 %v204_v6, %v196_v5  ;;  %v206_v10 = vld [vmem:[%s2361_s1 + $0x50] sm:$0xff]  ;;  %v221_v13 = vld [vmem:[%s2361_s1 + $0xc8] sm:$0xff]  ;;  %v215_v14 = vld [vmem:[%s2361_s1 + $0x98] sm:$0xff]  ;;  %s2373_s8 = smov (!%p180_p2, %s1922_s8), 7 }
  0x2e   : > { %1424 = vmatprep.subr.bf16.mxu0 %v1423_v3  ;;  %v1461_v12 = vpack.c.bf16 %v206_v10, %v198_v9  ;;  %v223_v15 = vld [vmem:[%s2361_s1 + $0xd8] sm:$0xff]  ;;  %1460 = vmatprep.subr.bf16.mxu1 %v1459_v7  ;;  %v1427_v16 = vpack.c.bf16 %v221_v13, %v213_v11  ;;  %v212_v18 = vld [vmem:[%s2361_s1 + $0x80] sm:$0xff]  ;;  %v214_v20 = vld [vmem:[%s2361_s1 + $0x90] sm:$0xff]  ;;  %s1225_s9 = sshll.u32 %s2373_s8, 4  ;;  %s1210_s17 = sshll.u32 %s2373_s8, 3 }
  0x2f   : > { %1426 = vmatpush1.bf16.msra.mxu0 %v1425_v8  ;;  %v1463_v17 = vpack.c.bf16 %v223_v15, %v215_v14  ;;  %v220_v19 = vld [vmem:[%s2361_s1 + $0xc0] sm:$0xff]  ;;  %v222_v22 = vld [vmem:[%s2361_s1 + $0xd0] sm:$0xff]  ;;  %v229_v23 = vld [vmem:[%s2361_s1 + $0x108] sm:$0xff]  ;;  %s2027_s25 = scalar_lea.vmem %s2360_s0, %s1225_s9  ;;  %s190_s20 = scalar_lea.vmem %s2363_s3, %s1210_s17 }
  0x30   : > { %1462 = vmatpush1.bf16.msra.mxu1 %v1461_v12  ;;  %v1429_v21 = vpack.c.bf16 %v220_v19, %v212_v18  ;;  %v237_v24 = vld [vmem:[%s2361_s1 + $0x148] sm:$0xff]  ;;  %1428 = vmatprep.subr.bf16.mxu0 %v1427_v16  ;;  %v1465_v25 = vpack.c.bf16 %v222_v22, %v214_v20  ;;  %v231_v27 = vld [vmem:[%s2361_s1 + $0x118] sm:$0xff]  ;;  %v228_v29 = vld [vmem:[%s2361_s1 + $0x100] sm:$0xff] }
  0x31   : > { %1464 = vmatprep.subr.bf16.mxu1 %v1463_v17  ;;  %v1431_v26 = vpack.c.bf16 %v237_v24, %v229_v23  ;;  %v239_v28 = vld [vmem:[%s2361_s1 + $0x158] sm:$0xff]  ;;  %v236_v31 = vld [vmem:[%s2361_s1 + $0x140] sm:$0xff]  ;;  %v230_v32 = vld [vmem:[%s2361_s1 + $0x110] sm:$0xff] }
  0x32   : > { %v1467_v30 = vpack.c.bf16 %v239_v28, %v231_v27  ;;  %v238_v33 = vld [vmem:[%s2361_s1 + $0x150] sm:$0xff]  ;;  %v1433_v34 = vpack.c.bf16 %v236_v31, %v228_v29  ;;  %v245_v35 = vld [vmem:[%s2361_s1 + $0x188] sm:$0xff]  ;;  %v247_v37 = vld [vmem:[%s2361_s1 + $0x198] sm:$0xff] }
  0x33   : > { %1430 = vmatpush1.bf16.msra.mxu0 %v1429_v21  ;;  %v253_v36 = vld [vmem:[%s2361_s1 + $0x1c8] sm:$0xff]  ;;  %v1469_v38 = vpack.c.bf16 %v238_v33, %v230_v32  ;;  %v255_v40 = vld [vmem:[%s2361_s1 + $0x1d8] sm:$0xff]  ;;  %v244_v41 = vld [vmem:[%s2361_s1 + $0x180] sm:$0xff] }
  0x34   : > { %1466 = vmatpush1.bf16.msra.mxu1 %v1465_v25  ;;  %1432 = vmatprep.subr.bf16.mxu0 %v1431_v26  ;;  %v1435_v39 = vpack.c.bf16 %v253_v36, %v245_v35  ;;  %v252_v42 = vld [vmem:[%s2361_s1 + $0x1c0] sm:$0xff]  ;;  %v1471_v43 = vpack.c.bf16 %v255_v40, %v247_v37  ;;  %v246_v44 = vld [vmem:[%s2361_s1 + $0x190] sm:$0xff]  ;;  %v261_v46 = vld [vmem:[%s2361_s1 + $0x208] sm:$0xff] }
  0x35   : > { %1468 = vmatprep.subr.bf16.mxu1 %v1467_v30  ;;  %v254_v45 = vld [vmem:[%s2361_s1 + $0x1d0] sm:$0xff]  ;;  %v269_v47 = vld [vmem:[%s2361_s1 + $0x248] sm:$0xff]  ;;  %v263_v48 = vld [vmem:[%s2361_s1 + $0x218] sm:$0xff]  ;;  %v1437_v50 = vpack.c.bf16 %v252_v42, %v244_v41 }
  0x36   : > { %v271_v49 = vld [vmem:[%s2361_s1 + $0x258] sm:$0xff]  ;;  %v1473_v51 = vpack.c.bf16 %v254_v45, %v246_v44  ;;  %v1439_v52 = vpack.c.bf16 %v269_v47, %v261_v46  ;;  %v260_v53 = vld [vmem:[%s2361_s1 + $0x200] sm:$0xff]  ;;  %v262_v55 = vld [vmem:[%s2361_s1 + $0x210] sm:$0xff] }
  0x37   : > { %1434 = vmatpush1.bf16.msra.mxu0 %v1433_v34  ;;  %v268_v54 = vld [vmem:[%s2361_s1 + $0x240] sm:$0xff]  ;;  %v1475_v56 = vpack.c.bf16 %v271_v49, %v263_v48  ;;  %v270_v57 = vld [vmem:[%s2361_s1 + $0x250] sm:$0xff]  ;;  %v277_v58 = vld [vmem:[%s2361_s1 + $0x288] sm:$0xff] }
  0x38   : > { %1470 = vmatpush1.bf16.msra.mxu1 %v1469_v38  ;;  %1436 = vmatprep.subr.bf16.mxu0 %v1435_v39  ;;  %v285_v59 = vld [vmem:[%s2361_s1 + $0x2c8] sm:$0xff]  ;;  %v279_v60 = vld [vmem:[%s2361_s1 + $0x298] sm:$0xff]  ;;  %v1441_v62 = vpack.c.bf16 %v268_v54, %v260_v53  ;;  %v1477_v63 = vpack.c.bf16 %v270_v57, %v262_v55  ;;  %v276_v1 = vld [vmem:[%s2361_s1 + $0x280] sm:$0xff] }
  0x39   : > { %1472 = vmatprep.subr.bf16.mxu1 %v1471_v43  ;;  %v287_v61 = vld [vmem:[%s2361_s1 + $0x2d8] sm:$0xff]  ;;  %v1443_v0 = vpack.c.bf16 %v285_v59, %v277_v58  ;;  %v284_v2 = vld [vmem:[%s2361_s1 + $0x2c0] sm:$0xff]  ;;  %v278_v3 = vld [vmem:[%s2361_s1 + $0x290] sm:$0xff] }
  0x3a   : > { %v1479_v4 = vpack.c.bf16 %v287_v61, %v279_v60  ;;  %v286_v5 = vld [vmem:[%s2361_s1 + $0x2d0] sm:$0xff]  ;;  %v293_v6 = vld [vmem:[%s2361_s1 + $0x308] sm:$0xff]  ;;  %v295_v8 = vld [vmem:[%s2361_s1 + $0x318] sm:$0xff]  ;;  %v1445_v10 = vpack.c.bf16 %v284_v2, %v276_v1 }
  0x3b   : > { %1438 = vmatpush1.bf16.msra.mxu0 %v1437_v50  ;;  %v301_v7 = vld [vmem:[%s2361_s1 + $0x348] sm:$0xff]  ;;  %v303_v9 = vld [vmem:[%s2361_s1 + $0x358] sm:$0xff]  ;;  %v1481_v11 = vpack.c.bf16 %v286_v5, %v278_v3  ;;  %v292_v13 = vld [vmem:[%s2361_s1 + $0x300] sm:$0xff] }
  0x3c   : > { %1474 = vmatpush1.bf16.msra.mxu1 %v1473_v51  ;;  %1440 = vmatprep.subr.bf16.mxu0 %v1439_v52  ;;  %v1447_v12 = vpack.c.bf16 %v301_v7, %v293_v6  ;;  %v300_v14 = vld [vmem:[%s2361_s1 + $0x340] sm:$0xff]  ;;  %v294_v15 = vld [vmem:[%s2361_s1 + $0x310] sm:$0xff]  ;;  %v1483_v16 = vpack.c.bf16 %v303_v9, %v295_v8  ;;  %v309_v18 = vld [vmem:[%s2361_s1 + $0x388] sm:$0xff] }
  0x3d   : > { %1476 = vmatprep.subr.bf16.mxu1 %v1475_v56  ;;  %v302_v17 = vld [vmem:[%s2361_s1 + $0x350] sm:$0xff]  ;;  %v317_v19 = vld [vmem:[%s2361_s1 + $0x3c8] sm:$0xff]  ;;  %v311_v20 = vld [vmem:[%s2361_s1 + $0x398] sm:$0xff]  ;;  %v1449_v22 = vpack.c.bf16 %v300_v14, %v292_v13 }
  0x3e   : > { %v319_v21 = vld [vmem:[%s2361_s1 + $0x3d8] sm:$0xff]  ;;  %v308_v23 = vld [vmem:[%s2361_s1 + $0x380] sm:$0xff]  ;;  %v1485_v24 = vpack.c.bf16 %v302_v17, %v294_v15  ;;  %v1451_v25 = vpack.c.bf16 %v317_v19, %v309_v18  ;;  %v310_v27 = vld [vmem:[%s2361_s1 + $0x390] sm:$0xff] }
  0x3f   : > { %1442 = vmatpush1.bf16.msra.mxu0 %v1441_v62  ;;  %v316_v26 = vld [vmem:[%s2361_s1 + $0x3c0] sm:$0xff]  ;;  %v2045_v28 = vld [vmem:[%s2027_s25 + $0x8] sm:$0xff]  ;;  %v1487_v29 = vpack.c.bf16 %v319_v21, %v311_v20  ;;  %v318_v30 = vld [vmem:[%s2361_s1 + $0x3d0] sm:$0xff] }
  0x40   : > { %1478 = vmatpush1.bf16.msra.mxu1 %v1477_v63  ;;  %1444 = vmatprep.subr.bf16.mxu0 %v1443_v0  ;;  %v325_v31 = vld [vmem:[%s2361_s1 + $0x408] sm:$0xff]  ;;  %v327_v33 = vld [vmem:[%s2361_s1 + $0x418] sm:$0xff]  ;;  %v1453_v35 = vpack.c.bf16 %v316_v26, %v308_v23  ;;  %v1489_v36 = vpack.c.bf16 %v318_v30, %v310_v27  ;;  %v324_v38 = vld [vmem:[%s2361_s1 + $0x400] sm:$0xff] }
  0x41   : > { %1480 = vmatprep.subr.bf16.mxu1 %v1479_v4  ;;  %v333_v32 = vld [vmem:[%s2361_s1 + $0x448] sm:$0xff]  ;;  %1211 = vmatprep.mubr.msk.f32.mxu0 %vm348_vm0, %v2045_v28  ;;  %v335_v34 = vld [vmem:[%s2361_s1 + $0x458] sm:$0xff]  ;;  %v332_v39 = vld [vmem:[%s2361_s1 + $0x440] sm:$0xff] }
  0x42   : > { %1213 = vmatprep.mubr.msk.f32.mxu1 %vm348_vm0, %v2045_v28  ;;  %v1455_v37 = vpack.c.bf16 %v333_v32, %v325_v31  ;;  %v1491_v40 = vpack.c.bf16 %v335_v34, %v327_v33  ;;  %v326_v41 = vld [vmem:[%s2361_s1 + $0x410] sm:$0xff]  ;;  %v1457_v43 = vpack.c.bf16 %v332_v39, %v324_v38  ;;  %v341_v45 = vld [vmem:[%s2361_s1 + $0x488] sm:$0xff]  ;;  %v343_v46 = vld [vmem:[%s2361_s1 + $0x498] sm:$0xff] }
  0x43   : > { %1446 = vmatpush1.bf16.msra.mxu0 %v1445_v10  ;;  %v334_v42 = vld [vmem:[%s2361_s1 + $0x450] sm:$0xff]  ;;  %v201_v47 = vld [vmem:[%s2361_s1 + $0x28] sm:$0xff]  ;;  %v340_v48 = vld [vmem:[%s2361_s1 + $0x480] sm:$0xff] }
  0x44   : > { %1482 = vmatpush1.bf16.msra.mxu1 %v1481_v11  ;;  %1448 = vmatprep.subr.bf16.mxu0 %v1447_v12  ;;  %v1493_v44 = vpack.c.bf16 %v334_v42, %v326_v41  ;;  %v209_v49 = vld [vmem:[%s2361_s1 + $0x68] sm:$0xff]  ;;  %v203_v50 = vld [vmem:[%s2361_s1 + $0x38] sm:$0xff]  ;;  %v342_v52 = vld [vmem:[%s2361_s1 + $0x490] sm:$0xff] }
  0x45   : > { %1484 = vmatprep.subr.bf16.mxu1 %v1483_v16  ;;  %v211_v51 = vld [vmem:[%s2361_s1 + $0x78] sm:$0xff]  ;;  %v200_v53 = vld [vmem:[%s2361_s1 + $0x20] sm:$0xff]  ;;  %v202_v55 = vld [vmem:[%s2361_s1 + $0x30] sm:$0xff]  ;;  %v1495_v60 = vpack.c.bf16 %v209_v49, %v201_v47 }
  0x46   : > { %v208_v54 = vld [vmem:[%s2361_s1 + $0x60] sm:$0xff]  ;;  %v210_v56 = vld [vmem:[%s2361_s1 + $0x70] sm:$0xff]  ;;  %v217_v57 = vld [vmem:[%s2361_s1 + $0xa8] sm:$0xff]  ;;  %v1531_v63 = vpack.c.bf16 %v211_v51, %v203_v50 }
  0x47   : > { %1450 = vmatpush1.bf16.msra.mxu0 %v1449_v22  ;;  %v225_v58 = vld [vmem:[%s2361_s1 + $0xe8] sm:$0xff]  ;;  %v2121_v59 = vld [vmem:[%s2027_s25] sm:$0xff]  ;;  %v219_v61 = vld [vmem:[%s2361_s1 + $0xb8] sm:$0xff]  ;;  %v1497_v0 = vpack.c.bf16 %v208_v54, %v200_v53  ;;  %v1533_v1 = vpack.c.bf16 %v210_v56, %v202_v55 }
  0x48   : > { %1486 = vmatpush1.bf16.msra.mxu1 %v1485_v24  ;;  %1452 = vmatprep.subr.bf16.mxu0 %v1451_v25  ;;  %v227_v62 = vld [vmem:[%s2361_s1 + $0xf8] sm:$0xff]  ;;  %v1499_v2 = vpack.c.bf16 %v225_v58, %v217_v57  ;;  %v216_v3 = vld [vmem:[%s2361_s1 + $0xa0] sm:$0xff]  ;;  %v218_v5 = vld [vmem:[%s2361_s1 + $0xb0] sm:$0xff] }
  0x49   : > { %1488 = vmatprep.subr.bf16.mxu1 %v1487_v29  ;;  %v224_v4 = vld [vmem:[%s2361_s1 + $0xe0] sm:$0xff]  ;;  %v1535_v6 = vpack.c.bf16 %v227_v62, %v219_v61  ;;  %v226_v7 = vld [vmem:[%s2361_s1 + $0xf0] sm:$0xff]  ;;  %v233_v8 = vld [vmem:[%s2361_s1 + $0x128] sm:$0xff] }
  0x4a   : > { %v241_v9 = vld [vmem:[%s2361_s1 + $0x168] sm:$0xff]  ;;  %v235_v10 = vld [vmem:[%s2361_s1 + $0x138] sm:$0xff]  ;;  %v1501_v12 = vpack.c.bf16 %v224_v4, %v216_v3  ;;  %v1537_v13 = vpack.c.bf16 %v226_v7, %v218_v5  ;;  %v232_v15 = vld [vmem:[%s2361_s1 + $0x120] sm:$0xff] }
  0x4b   : > { %1454 = vmatpush1.bf16.msra.mxu0 %v1453_v35  ;;  %v243_v11 = vld [vmem:[%s2361_s1 + $0x178] sm:$0xff]  ;;  %v1503_v14 = vpack.c.bf16 %v241_v9, %v233_v8  ;;  %v240_v16 = vld [vmem:[%s2361_s1 + $0x160] sm:$0xff]  ;;  %v234_v17 = vld [vmem:[%s2361_s1 + $0x130] sm:$0xff] }
  0x4c   : > { %1490 = vmatpush1.bf16.msra.mxu1 %v1489_v36  ;;  %1456 = vmatprep.subr.bf16.mxu0 %v1455_v37  ;;  %v1539_v18 = vpack.c.bf16 %v243_v11, %v235_v10  ;;  %v242_v19 = vld [vmem:[%s2361_s1 + $0x170] sm:$0xff]  ;;  %v249_v20 = vld [vmem:[%s2361_s1 + $0x1a8] sm:$0xff]  ;;  %v251_v22 = vld [vmem:[%s2361_s1 + $0x1b8] sm:$0xff]  ;;  %v1505_v24 = vpack.c.bf16 %v240_v16, %v232_v15 }
  0x4d   : > { %1492 = vmatprep.subr.bf16.mxu1 %v1491_v40  ;;  %v257_v21 = vld [vmem:[%s2361_s1 + $0x1e8] sm:$0xff]  ;;  %v259_v23 = vld [vmem:[%s2361_s1 + $0x1f8] sm:$0xff]  ;;  %v248_v25 = vld [vmem:[%s2361_s1 + $0x1a0] sm:$0xff]  ;;  %v1541_v27 = vpack.c.bf16 %v242_v19, %v234_v17 }
  0x4e   : > { %v2183_v26 = vld [vmem:[%s2027_s25 + $0x18] sm:$0xff]  ;;  %v1507_v29 = vpack.c.bf16 %v257_v21, %v249_v20  ;;  %v256_v30 = vld [vmem:[%s2361_s1 + $0x1e0] sm:$0xff]  ;;  %v250_v31 = vld [vmem:[%s2361_s1 + $0x1b0] sm:$0xff]  ;;  %v1543_v33 = vpack.c.bf16 %v259_v23, %v251_v22 }
  0x4f   : > { %1458 = vmatpush1.bf16.msra.mxu0 %v1457_v43  ;;  %v258_v32 = vld [vmem:[%s2361_s1 + $0x1f0] sm:$0xff]  ;;  %v265_v34 = vld [vmem:[%s2361_s1 + $0x228] sm:$0xff]  ;;  %v267_v37 = vld [vmem:[%s2361_s1 + $0x238] sm:$0xff]  ;;  %v1509_v39 = vpack.c.bf16 %v256_v30, %v248_v25 }
  0x50   : > { %1494 = vmatpush1.bf16.msra.mxu1 %v1493_v44  ;;  %391 = vmatprep.subr.mxu0 %v341_v45  ;;  %v273_v35 = vld [vmem:[%s2361_s1 + $0x268] sm:$0xff]  ;;  %v2203_v36 = vld [vmem:[%s2027_s25 + $0x10] sm:$0xff]  ;;  %v275_v38 = vld [vmem:[%s2361_s1 + $0x278] sm:$0xff]  ;;  %v1545_v40 = vpack.c.bf16 %v258_v32, %v250_v31 }
  0x51   : > { %468 = vmatprep.subr.mxu1 %v343_v46  ;;  %v1511_v41 = vpack.c.bf16 %v273_v35, %v265_v34  ;;  %v264_v42 = vld [vmem:[%s2361_s1 + $0x220] sm:$0xff]  ;;  %v266_v44 = vld [vmem:[%s2361_s1 + $0x230] sm:$0xff]  ;;  %v1547_v45 = vpack.c.bf16 %v275_v38, %v267_v37  ;;  %v281_v47 = vld [vmem:[%s2361_s1 + $0x2a8] sm:$0xff] }
  0x52   : > { %v272_v43 = vld [vmem:[%s2361_s1 + $0x260] sm:$0xff]  ;;  %v274_v46 = vld [vmem:[%s2361_s1 + $0x270] sm:$0xff]  ;;  %v283_v49 = vld [vmem:[%s2361_s1 + $0x2b8] sm:$0xff] }
  0x53   : > { %392 = vmatpush1.msra.mxu0 %v340_v48  ;;  %v289_v48 = vld [vmem:[%s2361_s1 + $0x2e8] sm:$0xff]  ;;  %v291_v50 = vld [vmem:[%s2361_s1 + $0x2f8] sm:$0xff]  ;;  %v1513_v51 = vpack.c.bf16 %v272_v43, %v264_v42  ;;  %v280_v54 = vld [vmem:[%s2361_s1 + $0x2a0] sm:$0xff] }
  0x54   : > { %469 = vmatpush1.msra.mxu1 %v342_v52  ;;  %420 = vmatmul.mubr.f32.vlgmr.msra.gmra.mrb[0].mxu0 %v2121_v59  ;;  %v1549_v52 = vpack.c.bf16 %v274_v46, %v266_v44  ;;  %v1515_v53 = vpack.c.bf16 %v289_v48, %v281_v47  ;;  %v288_v55 = vld [vmem:[%s2361_s1 + $0x2e0] sm:$0xff]  ;;  %v282_v56 = vld [vmem:[%s2361_s1 + $0x2b0] sm:$0xff]  ;;  %v297_v58 = vld [vmem:[%s2361_s1 + $0x328] sm:$0xff] }
  0x55   : > { %497 = vmatmul.mubr.f32.vlgmr.msra.gmra.mrb[0].mxu1 %v2121_v59  ;;  %1496 = vmatprep.subr.bf16.mxu0 %v1495_v60  ;;  %v290_v57 = vld [vmem:[%s2361_s1 + $0x2f0] sm:$0xff]  ;;  %v305_v60 = vld [vmem:[%s2361_s1 + $0x368] sm:$0xff]  ;;  %v299_v61 = vld [vmem:[%s2361_s1 + $0x338] sm:$0xff] }
  0x56   : > { %1532 = vmatprep.subr.bf16.mxu1 %v1531_v63  ;;  %1498 = vmatpush1.bf16.msra.mxu0 %v1497_v0  ;;  %v307_v62 = vld [vmem:[%s2361_s1 + $0x378] sm:$0xff]  ;;  %v1517_v63 = vpack.c.bf16 %v288_v55, %v280_v54  ;;  %v1553_v0 = vpack.c.bf16 %v290_v57, %v282_v56  ;;  %v304_v3 = vld [vmem:[%s2361_s1 + $0x360] sm:$0xff]  ;;  %v298_v4 = vld [vmem:[%s2361_s1 + $0x330] sm:$0xff] }
  0x57   : > { %1534 = vmatpush1.bf16.msra.mxu1 %v1533_v1  ;;  %1500 = vmatprep.subr.bf16.mxu0 %v1499_v2  ;;  %v1519_v1 = vpack.c.bf16 %v305_v60, %v297_v58  ;;  %v296_v2 = vld [vmem:[%s2361_s1 + $0x320] sm:$0xff]  ;;  %v1555_v5 = vpack.c.bf16 %v307_v62, %v299_v61  ;;  %v313_v7 = vld [vmem:[%s2361_s1 + $0x3a8] sm:$0xff]  ;;  %v315_v9 = vld [vmem:[%s2361_s1 + $0x3b8] sm:$0xff] }
  0x58   : > { %1536 = vmatprep.subr.bf16.mxu1 %v1535_v6  ;;  %1212 = vmatprep.mubr.msk.f32.mxu0 %vm348_vm0, %v2183_v26  ;;  %v306_v6 = vld [vmem:[%s2361_s1 + $0x370] sm:$0xff]  ;;  %v321_v8 = vld [vmem:[%s2361_s1 + $0x3e8] sm:$0xff]  ;;  %v323_v10 = vld [vmem:[%s2361_s1 + $0x3f8] sm:$0xff]  ;;  %v1521_v11 = vpack.c.bf16 %v304_v3, %v296_v2 }
  0x59   : > { %1214 = vmatprep.mubr.msk.f32.mxu1 %vm348_vm0, %v2183_v26  ;;  %426 = vmatmul.mubr.f32.gmra.mrb[2].mxu0 %v2203_v36  ;;  %v320_v15 = vld [vmem:[%s2361_s1 + $0x3e0] sm:$0xff]  ;;  %v314_v16 = vld [vmem:[%s2361_s1 + $0x3b0] sm:$0xff]  ;;  %v1559_v17 = vpack.c.bf16 %v323_v10, %v315_v9  ;;  %v329_v19 = vld [vmem:[%s2361_s1 + $0x428] sm:$0xff] }
  0x5a   : > { %1502 = vmatpush1.bf16.msra.mxu0 %v1501_v12  ;;  %503 = vmatmul.mubr.f32.gmra.mrb[2].mxu1 %v2203_v36  ;;  %v1557_v12 = vpack.c.bf16 %v306_v6, %v298_v4  ;;  %v337_v20 = vld [vmem:[%s2361_s1 + $0x468] sm:$0xff]  ;;  %v331_v21 = vld [vmem:[%s2361_s1 + $0x438] sm:$0xff]  ;;  %v330_v31 = vld [vmem:[%s2361_s1 + $0x430] sm:$0xff] }
  0x5b   : > { %1538 = vmatpush1.bf16.msra.mxu1 %v1537_v13  ;;  %1504 = vmatprep.subr.bf16.mxu0 %v1503_v14  ;;  %v1523_v13 = vpack.c.bf16 %v321_v8, %v313_v7  ;;  %v312_v14 = vld [vmem:[%s2361_s1 + $0x3a0] sm:$0xff]  ;;  %v339_v22 = vld [vmem:[%s2361_s1 + $0x478] sm:$0xff]  ;;  %v1527_v25 = vpack.c.bf16 %v337_v20, %v329_v19  ;;  %v338_v32 = vld [vmem:[%s2361_s1 + $0x470] sm:$0xff] }
  0x5c   : > { %1540 = vmatprep.subr.bf16.mxu1 %v1539_v18  ;;  %1215 = vmatprep.mubr.msk.f32.mxu0 %vm348_vm0, %v2045_v28  ;;  %v322_v18 = vld [vmem:[%s2361_s1 + $0x3f0] sm:$0xff]  ;;  %v1525_v23 = vpack.c.bf16 %v320_v15, %v312_v14  ;;  %v1563_v30 = vpack.c.bf16 %v339_v22, %v331_v21  ;;  %v1565_v34 = vpack.c.bf16 %v338_v32, %v330_v31  ;;  %v345_v35 = vld [vmem:[%s2361_s1 + $0x4a8] sm:$0xff]  ;;  %v347_v37 = vld [vmem:[%s2361_s1 + $0x4b8] sm:$0xff] }
  0x5d   : > { %1217 = vmatprep.mubr.msk.f32.mxu1 %vm348_vm0, %v2045_v28  ;;  %v1551_v28 = vpack.c.bf16 %v291_v50, %v283_v49  ;;  %v344_v38 = vld [vmem:[%s2361_s1 + $0x4a0] sm:$0xff]  ;;  %v692_v44 = vld [vmem:[#allocation2 + $0x8] sm:$0xff]  ;;  %v710_v46 = vld [vmem:[#allocation2 + $0x98] sm:$0xff] }
  0x5e   : > { %1506 = vmatpush1.bf16.msra.mxu0 %v1505_v24  ;;  %v1561_v24 = vpack.c.bf16 %v322_v18, %v314_v16  ;;  %v691_v42 = vld [vmem:[#allocation2] sm:$0xff]  ;;  %v694_v49 = vld [vmem:[#allocation2 + $0x18] sm:$0xff]  ;;  %v713_v54 = vld [vmem:[#allocation2 + $0xb0] sm:$0xff] }
  0x5f   : > { %1542 = vmatpush1.bf16.msra.mxu1 %v1541_v27  ;;  %1508 = vmatprep.subr.bf16.mxu0 %v1507_v29  ;;  %v328_v27 = vld [vmem:[%s2361_s1 + $0x420] sm:$0xff]  ;;  %v1569_v47 = vpack.c.bf16 %v692_v44, %v691_v42  ;;  %v714_v55 = vld [vmem:[#allocation2 + $0xb8] sm:$0xff]  ;;  %v697_v57 = vld [vmem:[#allocation2 + $0x30] sm:$0xff] }
  0x60   : > { %1544 = vmatprep.subr.bf16.mxu1 %v1543_v33  ;;  %v336_v29 = vld [vmem:[%s2361_s1 + $0x460] sm:$0xff]  ;;  %v698_v58 = vld [vmem:[#allocation2 + $0x38] sm:$0xff]  ;;  %v716_v61 = vld [vmem:[#allocation2 + $0xc8] sm:$0xff] }
  0x61   : > { %v1529_v33 = vpack.c.bf16 %v336_v29, %v328_v27  ;;  %v711_v50 = vld [vmem:[#allocation2 + $0xa0] sm:$0xff]  ;;  %v1581_v62 = vpack.c.bf16 %v698_v58, %v697_v57  ;;  %v717_v2 = vld [vmem:[#allocation2 + $0xd0] sm:$0xff]  ;;  %v718_v3 = vld [vmem:[#allocation2 + $0xd8] sm:$0xff] }
  0x62   : > { %1510 = vmatpush1.bf16.msra.mxu0 %v1509_v39  ;;  %v346_v39 = vld [vmem:[%s2361_s1 + $0x4b0] sm:$0xff]  ;;  %v715_v60 = vld [vmem:[#allocation2 + $0xc0] sm:$0xff]  ;;  %v702_v7 = vld [vmem:[#allocation2 + $0x58] sm:$0xff] }
  0x63   : > { %1546 = vmatpush1.bf16.msra.mxu1 %v1545_v40  ;;  %1512 = vmatprep.subr.bf16.mxu0 %v1511_v41  ;;  %v707_v40 = vld [vmem:[#allocation2 + $0x80] sm:$0xff]  ;;  %v708_v41 = vld [vmem:[#allocation2 + $0x88] sm:$0xff]  ;;  %v701_v6 = vld [vmem:[#allocation2 + $0x50] sm:$0xff] }
  0x64   : > { %1548 = vmatprep.subr.bf16.mxu1 %v1547_v45  ;;  %v1567_v43 = vpack.c.bf16 %v708_v41, %v707_v40  ;;  %v709_v45 = vld [vmem:[#allocation2 + $0x90] sm:$0xff]  ;;  %v1589_v8 = vpack.c.bf16 %v702_v7, %v701_v6  ;;  %v719_v9 = vld [vmem:[#allocation2 + $0xe0] sm:$0xff]  ;;  %v720_v10 = vld [vmem:[#allocation2 + $0xe8] sm:$0xff] }
  0x65   : > { %v1571_v48 = vpack.c.bf16 %v710_v46, %v709_v45  ;;  %v721_v15 = vld [vmem:[#allocation2 + $0xf0] sm:$0xff]  ;;  %v722_v16 = vld [vmem:[#allocation2 + $0xf8] sm:$0xff]  ;;  %v805_v21 = vld [vmem:[#allocation2 + $0x108] sm:$0xff] }
  0x66   : > { %1514 = vmatpush1.bf16.msra.mxu0 %v1513_v51  ;;  %v712_v51 = vld [vmem:[#allocation2 + $0xa8] sm:$0xff]  ;;  %v705_v18 = vld [vmem:[#allocation2 + $0x70] sm:$0xff]  ;;  %v706_v19 = vld [vmem:[#allocation2 + $0x78] sm:$0xff] }
  0x67   : > { %1550 = vmatpush1.bf16.msra.mxu1 %v1549_v52  ;;  %1516 = vmatprep.subr.bf16.mxu0 %v1515_v53  ;;  %v1575_v52 = vpack.c.bf16 %v712_v51, %v711_v50  ;;  %v695_v53 = vld [vmem:[#allocation2 + $0x20] sm:$0xff]  ;;  %v1597_v20 = vpack.c.bf16 %v706_v19, %v705_v18  ;;  %v806_v22 = vld [vmem:[#allocation2 + $0x110] sm:$0xff]  ;;  %v809_v29 = vld [vmem:[#allocation2 + $0x128] sm:$0xff] }
  0x68   : > { %1552 = vmatprep.subr.bf16.mxu1 %v1551_v28  ;;  %v1579_v28 = vpack.c.bf16 %v714_v55, %v713_v54  ;;  %v811_v32 = vld [vmem:[#allocation2 + $0x138] sm:$0xff]  ;;  %v817_v19 = vld [vmem:[#allocation2 + $0x168] sm:$0xff] }
  0x6a   : > { %1518 = vmatpush1.bf16.msra.mxu0 %v1517_v63  ;;  %v1583_v63 = vpack.c.bf16 %v716_v61, %v715_v60 }
  0x6b   : > { %1554 = vmatpush1.bf16.msra.mxu1 %v1553_v0  ;;  %1520 = vmatprep.subr.bf16.mxu0 %v1519_v1  ;;  %v699_v0 = vld [vmem:[#allocation2 + $0x40] sm:$0xff]  ;;  %v700_v1 = vld [vmem:[#allocation2 + $0x48] sm:$0xff] }
  0x6c   : > { %1556 = vmatprep.subr.bf16.mxu1 %v1555_v5  ;;  %v1585_v4 = vpack.c.bf16 %v700_v1, %v699_v0  ;;  %v1587_v5 = vpack.c.bf16 %v718_v3, %v717_v2 }
  0x6e   : > { %1522 = vmatpush1.bf16.msra.mxu0 %v1521_v11  ;;  %v1591_v11 = vpack.c.bf16 %v720_v10, %v719_v9 }
  0x6f   : > { %1558 = vmatpush1.bf16.msra.mxu1 %v1557_v12  ;;  %1524 = vmatprep.subr.bf16.mxu0 %v1523_v13  ;;  %v703_v12 = vld [vmem:[#allocation2 + $0x60] sm:$0xff]  ;;  %v704_v13 = vld [vmem:[#allocation2 + $0x68] sm:$0xff] }
  0x70   : > { %1560 = vmatprep.subr.bf16.mxu1 %v1559_v17  ;;  %v1593_v14 = vpack.c.bf16 %v704_v13, %v703_v12  ;;  %v1595_v17 = vpack.c.bf16 %v722_v16, %v721_v15  ;;  %v815_v16 = vld [vmem:[#allocation2 + $0x158] sm:$0xff] }
  0x72   : > { %1526 = vmatpush1.bf16.msra.mxu0 %v1525_v23  ;;  %v807_v23 = vld [vmem:[#allocation2 + $0x118] sm:$0xff] }
  0x73   : > { %1562 = vmatpush1.bf16.msra.mxu1 %v1561_v24  ;;  %1528 = vmatprep.subr.bf16.mxu0 %v1527_v25  ;;  %v1599_v24 = vpack.c.bf16 %v806_v22, %v805_v21  ;;  %v808_v25 = vld [vmem:[#allocation2 + $0x120] sm:$0xff]  ;;  %v819_v22 = vld [vmem:[#allocation2 + $0x178] sm:$0xff] }
  0x74   : > { %1564 = vmatprep.subr.bf16.mxu1 %v1563_v30  ;;  %v1603_v27 = vpack.c.bf16 %v808_v25, %v807_v23  ;;  %v810_v30 = vld [vmem:[#allocation2 + $0x130] sm:$0xff]  ;;  %v820_v23 = vld [vmem:[#allocation2 + $0x180] sm:$0xff] }
  0x75   : > { %v1607_v31 = vpack.c.bf16 %v810_v30, %v809_v29  ;;  %v903_v25 = vld [vmem:[#allocation2 + $0x190] sm:$0xff]  ;;  %v905_v29 = vld [vmem:[#allocation2 + $0x1a0] sm:$0xff] }
  0x76   : > { %1530 = vmatpush1.bf16.msra.mxu0 %v1529_v33  ;;  %v812_v33 = vld [vmem:[#allocation2 + $0x140] sm:$0xff] }
  0x77   : > { %1566 = vmatpush1.bf16.msra.mxu1 %v1565_v34  ;;  %545 = vmatprep.subr.mxu0 %v345_v35  ;;  %v1611_v34 = vpack.c.bf16 %v812_v33, %v811_v32  ;;  %v813_v35 = vld [vmem:[#allocation2 + $0x148] sm:$0xff]  ;;  %v907_v33 = vld [vmem:[#allocation2 + $0x1b0] sm:$0xff] }
  0x78   : > { %622 = vmatprep.subr.mxu1 %v347_v37  ;;  %v814_v37 = vld [vmem:[#allocation2 + $0x150] sm:$0xff] }
  0x7a   : > { %546 = vmatpush1.msra.mxu0 %v344_v38  ;;  %v1615_v38 = vpack.c.bf16 %v814_v37, %v813_v35  ;;  %v909_v37 = vld [vmem:[#allocation2 + $0x1c0] sm:$0xff] }
  0x7b   : > { %623 = vmatpush1.msra.mxu1 %v346_v39  ;;  %574 = vmatmul.mubr.f32.vlgmr.msra.gmra.mrb[4].mxu0 %v2121_v59 }
  0x7c   : > { %651 = vmatmul.mubr.f32.vlgmr.msra.gmra.mrb[4].mxu1 %v2121_v59  ;;  %1216 = vmatprep.mubr.msk.f32.mxu0 %vm348_vm0, %v2183_v26  ;;  %v693_v59 = vld [vmem:[#allocation2 + $0x10] sm:$0xff] }
  0x7d   : > { %1218 = vmatprep.mubr.msk.f32.mxu1 %vm348_vm0, %v2183_v26  ;;  %1568 = vmatprep.subr.bf16.mxu0 %v1567_v43  ;;  %v1573_v26 = vpack.c.bf16 %v694_v49, %v693_v59 }
  0x7e   : > { %1570 = vmatpush3.bf16.msra.mxu0 %v1569_v47  ;;  %1600 = vmatprep.subr.bf16.mxu1 %v1599_v24 }
  0x7f   : > { %580 = vmatmul.mubr.f32.gmra.mrb[6].mxu0 %v2203_v36  ;;  %1572 = vmatprep.subr.bf16.mxu0 %v1571_v48 }
  0x80   : > { %657 = vmatmul.mubr.f32.gmra.mrb[6].mxu1 %v2203_v36  ;;  %v696_v36 = vld [vmem:[#allocation2 + $0x28] sm:$0xff] }
  0x81   : > { %v1577_v56 = vpack.c.bf16 %v696_v36, %v695_v53  ;;  %1602 = vmatpush3.bf16.msra.mxu1 %v1599_v24  ;;  %v1627_v24 = vpack.c.bf16 %v820_v23, %v819_v22  ;;  %v1014_v22 = vld [vmem:[#allocation2 + $0x280] sm:$0xff]  ;;  %v1015_v23 = vld [vmem:[#allocation2 + $0x288] sm:$0xff] }
  0x82   : > { %1574 = vmatpush3.bf16.msra.mxu0 %v1573_v26  ;;  %1604 = vmatprep.subr.bf16.mxu1 %v1603_v27 }
  0x83   : > { %1576 = vmatprep.subr.bf16.mxu0 %v1575_v52 }
  0x85   : > { %1606 = vmatpush3.bf16.msra.mxu1 %v1603_v27  ;;  %v904_v27 = vld [vmem:[#allocation2 + $0x198] sm:$0xff] }
  0x86   : > { %1578 = vmatpush3.bf16.msra.mxu0 %v1577_v56  ;;  %1608 = vmatprep.subr.bf16.mxu1 %v1607_v31  ;;  %v1631_v30 = vpack.c.bf16 %v904_v27, %v903_v25  ;;  %v1016_v25 = vld [vmem:[#allocation2 + $0x290] sm:$0xff] }
  0x87   : > { %1580 = vmatprep.subr.bf16.mxu0 %v1579_v28  ;;  %v1691_v27 = vpack.c.bf16 %v1016_v25, %v1015_v23 }
  0x89   : > { %1610 = vmatpush3.bf16.msra.mxu1 %v1607_v31  ;;  %v906_v31 = vld [vmem:[#allocation2 + $0x1a8] sm:$0xff] }
  0x8a   : > { %1582 = vmatpush3.bf16.msra.mxu0 %v1581_v62  ;;  %1612 = vmatprep.subr.bf16.mxu1 %v1611_v34  ;;  %v1635_v32 = vpack.c.bf16 %v906_v31, %v905_v29  ;;  %v1221_v29 = vld [vmem:[#allocation2 + $0x210] ss:$0 sm:$0xff] }
  0x8b   : > { %1584 = vmatprep.subr.bf16.mxu0 %v1583_v63 }
  0x8d   : > { %1614 = vmatpush3.bf16.msra.mxu1 %v1611_v34  ;;  %v908_v34 = vld [vmem:[#allocation2 + $0x1b8] sm:$0xff] }
  0x8e   : > { %1586 = vmatpush3.bf16.msra.mxu0 %v1585_v4  ;;  %1616 = vmatprep.subr.bf16.mxu1 %v1615_v38  ;;  %v1639_v35 = vpack.c.bf16 %v908_v34, %v907_v33 }
  0x8f   : > { %1588 = vmatprep.subr.bf16.mxu0 %v1587_v5 }
  0x91   : > { %1618 = vmatpush3.bf16.msra.mxu1 %v1615_v38  ;;  %v910_v38 = vld [vmem:[#allocation2 + $0x1c8] sm:$0xff] }
  0x92   : > { %1590 = vmatpush3.bf16.msra.mxu0 %v1589_v8 }
  0x93   : > { %1592 = vmatprep.subr.bf16.mxu0 %v1591_v11 }
  0x96   : > { %1594 = vmatpush3.bf16.msra.mxu0 %v1593_v14 }
  0x97   : > { %1596 = vmatprep.subr.bf16.mxu0 %v1595_v17  ;;  %v816_v17 = vld [vmem:[#allocation2 + $0x160] sm:$0xff] }
  0x98   : > { %v1619_v18 = vpack.c.bf16 %v816_v17, %v815_v16  ;;  %v1010_v16 = vld [vmem:[#allocation2 + $0x260] sm:$0xff] }
  0x9a   : > { %1598 = vmatpush3.bf16.msra.mxu0 %v1597_v20  ;;  %1620 = vmatprep.subr.bf16.mxu1 %v1619_v18  ;;  %v818_v20 = vld [vmem:[#allocation2 + $0x170] sm:$0xff] }
  0x9b   : > { %1622 = vmatpush3.bf16.msra.mxu1 %v1619_v18  ;;  %v1623_v21 = vpack.c.bf16 %v818_v20, %v817_v19  ;;  %1632 = vmatprep.subr.bf16.mxu0 %v1631_v30  ;;  %v1011_v18 = vld [vmem:[#allocation2 + $0x268] sm:$0xff]  ;;  %v1012_v19 = vld [vmem:[#allocation2 + $0x270] sm:$0xff] }
  0x9c   : > { %v1683_v20 = vpack.c.bf16 %v1012_v19, %v1011_v18 }
  0x9d   : > { %1624 = vmatprep.subr.bf16.mxu1 %v1623_v21 }
  0x9f   : > { %1626 = vmatpush3.bf16.msra.mxu1 %v1623_v21  ;;  %v1013_v21 = vld [vmem:[#allocation2 + $0x278] sm:$0xff] }
  0xa0   : > { %1628 = vmatprep.subr.bf16.mxu1 %v1627_v24 }
  0xa3   : > { %1630 = vmatpush3.bf16.msra.mxu1 %v1627_v24  ;;  %v1687_v24 = vpack.c.bf16 %v1014_v22, %v1013_v21 }
 0x127   : > { %v421_v39 = vpop.f32.mrb[0].mxu0 }
 0x128   : > { %v663_v40 = vmax.f32 %v421_v39, 0.0  ;;  %v498_v41 = vpop.f32.mrb[0].mxu1  ;;  %v423_v42 = vpop.f32.mrb[1].mxu0  ;;  %v1643_v39 = vpack.c.bf16 %v910_v38, %v909_v37  ;;  %v1097_v37 = vlaneseq }
 0x129   : > { %v665_v43 = vmax.f32 %v498_v41, 0.0  ;;  %v664_v44 = vmax.f32 %v423_v42, 0.0  ;;  %v500_v45 = vpop.f32.mrb[1].mxu1  ;;  %v912_v41 = vld [vmem:[#allocation2 + $0x1d8] sm:$0xff] }
 0x12a   : > { %v666_v46 = vmax.f32 %v500_v45, 0.0  ;;  %v1098_v38 = vand.u32 127, %v1097_v37 }
 0x12b   : > { %v679_v47 = vmax.f32 %v663_v40, %v665_v43  ;;  %v911_v40 = vld [vmem:[#allocation2 + $0x1d0] sm:$0xff]  ;;  %v913_v43 = vld [vmem:[#allocation2 + $0x1e0] sm:$0xff] }
 0x12c   : > { %v680_v48 = vmax.f32 %v664_v44, %v666_v46  ;;  %v427_v59 = vpop.f32.mrb[2].mxu0  ;;  %v1647_v42 = vpack.c.bf16 %v912_v41, %v911_v40  ;;  %v914_v44 = vld [vmem:[#allocation2 + $0x1e8] sm:$0xff]  ;;  %v915_v46 = vld [vmem:[#allocation2 + $0x1f0] sm:$0xff]  ;;  %vm1124_vm1 = vcmp.eq.s32.totalorder %v1098_v38, 7  ;;  %vm1099_vm2 = vcmp.lt.s32.totalorder %v1098_v38, 7 }
 0x12d   : > { %v671_v49 = vmax.f32 %v427_v59, 0.0  ;;  %v504_v50 = vpop.f32.mrb[2].mxu1  ;;  %v429_v51 = vpop.f32.mrb[3].mxu0  ;;  %v1651_v45 = vpack.c.bf16 %v914_v44, %v913_v43 }
 0x12e   : > { %v673_v26 = vmax.f32 %v504_v50, 0.0  ;;  %v672_v52 = vmax.f32 %v429_v51, 0.0  ;;  %v506_v53 = vpop.f32.mrb[3].mxu1 }
 0x12f   : > { %v674_v36 = vmax.f32 %v506_v53, 0.0 }
 0x130   : > { %v681_v54 = vmax.f32 %v671_v49, %v673_v26  ;;  %v1219_v49 = vld [vmem:[#allocation2 + $0x100] ss:$0 sm:$0xff] }
 0x131   : > { %v682_v55 = vmax.f32 %v672_v52, %v674_v36 }
 0x14e   : > { %v575_v56 = vpop.f32.mrb[4].mxu0 }
 0x14f   : > { %v667_v28 = vmax.f32 %v575_v56, 0.0  ;;  %v652_v57 = vpop.f32.mrb[4].mxu1  ;;  %v577_v58 = vpop.f32.mrb[5].mxu0 }
 0x150   : > { %v669_v60 = vmax.f32 %v652_v57, 0.0  ;;  %v668_v61 = vmax.f32 %v577_v58, 0.0  ;;  %v654_v62 = vpop.f32.mrb[5].mxu1  ;;  %v918_v57 = vld [vmem:[#allocation2 + $0x208] sm:$0xff] }
 0x151   : > { %v670_v63 = vmax.f32 %v654_v62, 0.0  ;;  %v1003_v62 = vld [vmem:[#allocation2 + $0x228] sm:$0xff] }
 0x152   : > { %v683_v0 = vmax.f32 %v667_v28, %v669_v60  ;;  %v581_v1 = vpop.f32.mrb[6].mxu0  ;;  %v917_v28 = vld [vmem:[#allocation2 + $0x200] sm:$0xff]  ;;  %v1001_v60 = vld [vmem:[#allocation2 + $0x218] sm:$0xff] }
 0x153   : > { %v684_v2 = vmax.f32 %v668_v61, %v670_v63  ;;  %v675_v3 = vmax.f32 %v581_v1, 0.0  ;;  %v658_v4 = vpop.f32.mrb[6].mxu1  ;;  %v583_v5 = vpop.f32.mrb[7].mxu0  ;;  %v1659_v58 = vpack.c.bf16 %v918_v57, %v917_v28  ;;  %v1002_v61 = vld [vmem:[#allocation2 + $0x220] sm:$0xff] }
 0x154   : > { %v687_v6 = vmax.f32 %v679_v47, %v683_v0  ;;  %v677_v7 = vmax.f32 %v658_v4, 0.0  ;;  %v676_v8 = vmax.f32 %v583_v5, 0.0  ;;  %v660_v9 = vpop.f32.mrb[7].mxu1  ;;  %v916_v47 = vld [vmem:[#allocation2 + $0x1f8] sm:$0xff]  ;;  %v1663_v63 = vpack.c.bf16 %v1002_v61, %v1001_v60  ;;  %v1004_v0 = vld [vmem:[#allocation2 + $0x230] sm:$0xff]  ;;  %v1007_v5 = vld [vmem:[#allocation2 + $0x248] sm:$0xff] }
 0x155   : > { %v678_v10 = vmax.f32 %v660_v9, 0.0  ;;  %v688_v11 = vmax.f32 %v680_v48, %v684_v2  ;;  %v1655_v48 = vpack.c.bf16 %v916_v47, %v915_v46  ;;  %v1667_v1 = vpack.c.bf16 %v1004_v0, %v1003_v62  ;;  %v1005_v2 = vld [vmem:[#allocation2 + $0x238] sm:$0xff] }
 0x156   : > { %v685_v12 = vmax.f32 %v675_v3, %v677_v7  ;;  %v1006_v3 = vld [vmem:[#allocation2 + $0x240] sm:$0xff]  ;;  %1664 = vmatprep.subr.bf16.mxu1 %v1663_v63 }
 0x157   : > { %v686_v13 = vmax.f32 %v676_v8, %v678_v10  ;;  %792 = vmatprep.mubr.f32.mxu0 %v688_v11  ;;  %v1671_v4 = vpack.c.bf16 %v1006_v3, %v1005_v2  ;;  %v1220_v8 = vld [vmem:[#allocation2 + $0x188] ss:$0 sm:$0xff] }
 0x158   : > { %793 = vmatmul.mubr.f32.vlgmr.msra.gmra.mrb[8].mxu0 %v687_v6  ;;  %v689_v14 = vmax.f32 %v681_v54, %v685_v12  ;;  %v1008_v6 = vld [vmem:[#allocation2 + $0x250] sm:$0xff] }
 0x159   : > { %v690_v15 = vmax.f32 %v682_v55, %v686_v13  ;;  %1634 = vmatpush3.bf16.msra.mxu0 %v1631_v30  ;;  %v1675_v7 = vpack.c.bf16 %v1008_v6, %v1007_v5 }
 0x15a   : > { %1636 = vmatprep.subr.bf16.mxu0 %v1635_v32 }
 0x15b   : > { %797 = vmatprep.mubr.f32.mxu0 %v690_v15  ;;  %v1009_v15 = vld [vmem:[#allocation2 + $0x258] sm:$0xff] }
 0x15c   : > { %798 = vmatmul.mubr.f32.gmra.mrb[10].mxu0 %v689_v14  ;;  %v1679_v17 = vpack.c.bf16 %v1010_v16, %v1009_v15 }
 0x15d   : > { %1638 = vmatpush3.bf16.msra.mxu0 %v1635_v32 }
 0x15e   : > { %1640 = vmatprep.subr.bf16.mxu0 %v1639_v35 }
 0x161   : > { %1642 = vmatpush3.bf16.msra.mxu0 %v1639_v35 }
 0x162   : > { %1644 = vmatprep.subr.bf16.mxu0 %v1643_v39 }
 0x165   : > { %1646 = vmatpush3.bf16.msra.mxu0 %v1643_v39  ;;  %v1222_v39 = vld [vmem:[#allocation2 + $0x298] ss:$0 sm:$0xff] }
 0x166   : > { %1648 = vmatprep.subr.bf16.mxu0 %v1647_v42 }
 0x169   : > { %1650 = vmatpush3.bf16.msra.mxu0 %v1647_v42 }
 0x16a   : > { %1652 = vmatprep.subr.bf16.mxu0 %v1651_v45 }
 0x16d   : > { %1654 = vmatpush3.bf16.msra.mxu0 %v1651_v45 }
 0x16e   : > { %1656 = vmatprep.subr.bf16.mxu0 %v1655_v48 }
 0x171   : > { %1658 = vmatpush3.bf16.msra.mxu0 %v1655_v48 }
 0x172   : > { %1660 = vmatprep.subr.bf16.mxu0 %v1659_v58 }
 0x175   : > { %1662 = vmatpush3.bf16.msra.mxu0 %v1659_v58 }
 0x22b   : > { %v1258_v59 = vpop.f32.mrb[8].mxu0 }
 0x22c   : > { %v1259_v50 = vpop.f32.mrb[9].mxu0 }
 0x22d   : > { %v1260_v51 = vadd.f32 %v1259_v50, %v1258_v59 }
 0x22f   : > { %v795_v26 = vadd.f32 %v1260_v51, %v1219_v49  ;;  %v1261_v52 = vpop.f32.mrb[10].mxu0 }
 0x230   : > { %v1262_v53 = vpop.f32.mrb[11].mxu0 }
 0x231   : > { %v803_v36 = vmax.f32 %v795_v26, 0.0  ;;  %v1263_v54 = vadd.f32 %v1262_v53, %v1261_v52 }
 0x233   : > { %v800_v55 = vadd.f32 %v1263_v54, %v1219_v49  ;;  %1350 = vmatprep.mubr.f32.mxu1 %v803_v36 }
 0x235   : > { %v804_v56 = vmax.f32 %v800_v55, 0.0 }
 0x237   : > { %1351 = vmatmul.mubr.f32.vlgmr.msra.gmra.mrb[8].mxu1 %v804_v56 }
 0x238   : > { %1666 = vmatpush3.bf16.msra.mxu1 %v1663_v63 }
 0x239   : > { %1668 = vmatprep.subr.bf16.mxu1 %v1667_v1 }
 0x23c   : > { %1670 = vmatpush3.bf16.msra.mxu1 %v1667_v1 }
 0x23d   : > { %1672 = vmatprep.subr.bf16.mxu1 %v1671_v4 }
 0x240   : > { %1674 = vmatpush3.bf16.msra.mxu1 %v1671_v4 }
 0x241   : > { %1676 = vmatprep.subr.bf16.mxu1 %v1675_v7 }
 0x244   : > { %1678 = vmatpush3.bf16.msra.mxu1 %v1675_v7 }
 0x245   : > { %1680 = vmatprep.subr.bf16.mxu1 %v1679_v17 }
 0x248   : > { %1682 = vmatpush3.bf16.msra.mxu1 %v1679_v17 }
 0x249   : > { %1684 = vmatprep.subr.bf16.mxu1 %v1683_v20 }
 0x24c   : > { %1686 = vmatpush3.bf16.msra.mxu1 %v1683_v20 }
 0x24d   : > { %1688 = vmatprep.subr.bf16.mxu1 %v1687_v24 }
 0x250   : > { %1690 = vmatpush3.bf16.msra.mxu1 %v1687_v24 }
 0x251   : > { %1692 = vmatprep.subr.bf16.mxu1 %v1691_v27 }
 0x254   : > { %1694 = vmatpush3.bf16.msra.mxu1 %v1691_v27 }
 0x30a   : > { %v1352_v9 = vpop.f32.mrb[8].mxu1 }
 0x30b   : > { %v898_v10 = vadd.f32 %v1352_v9, %v1220_v8  ;;  %v892_v11 = vpop.f32.mrb[9].mxu1 }
 0x30c   : > { %v893_v12 = vadd.f32 %v1220_v8, %v892_v11 }
 0x30d   : > { %v902_v14 = vmax.f32 %v898_v10, 0.0 }
 0x30e   : > { %v901_v13 = vmax.f32 %v893_v12, 0.0 }
 0x310   : > { %1385 = vmatprep.mubr.f32.mxu0 %v901_v13 }
 0x311   : > { %1386 = vmatmul.mubr.f32.vlgmr.msra.gmra.mrb[12].mxu0 %v902_v14 }
 0x3e4   : > { %v1387_v30 = vpop.f32.mrb[12].mxu0 }
 0x3e5   : > { %v996_v31 = vadd.f32 %v1387_v30, %v1221_v29  ;;  %v990_v32 = vpop.f32.mrb[13].mxu0 }
 0x3e6   : > { %v991_v33 = vadd.f32 %v1221_v29, %v990_v32 }
 0x3e8   : > { %1716 = vtanh.f32 %v991_v33 }
 0x3e9   : > { %1718 = vtanh.f32 %v996_v31 }
 0x3f2   : > { %v1717_v34 = vpop.eup %1716 }
 0x3f3   : > { %v1719_v35 = vpop.eup %1718  ;;  %1420 = vmatprep.mubr.f32.mxu1 %v1717_v34 }
 0x3f4   : > { %1421 = vmatmul.mubr.f32.vlgmr.msra.gmra.mrb[10].mxu1 %v1719_v35 }
 0x4c7   : > { %v1422_v40 = vpop.f32.mrb[10].mxu1 }
 0x4c8   : > { %v1094_v41 = vadd.f32 %v1422_v40, %v1222_v39  ;;  %v1088_v42 = vpop.f32.mrb[11].mxu1 }
 0x4c9   : > { %v1089_v43 = vadd.f32 %v1222_v39, %v1088_v42 }
 0x4ca   : > { %v1126_v44 = vsel %vm1124_vm1, %v1094_v41, 0.0  ;;  %v1101_v47 = vsel %vm1099_vm2, %v1094_v41, -1e+30 }
 0x4cb   : > { %v1125_v45 = vsel %vm1124_vm1, %v1089_v43, 0.0  ;;  %v1100_v46 = vsel %vm1099_vm2, %v1089_v43, -1e+30 }
 0x4cc   : > { %1102 = vmax.xlane.f32.xlu0 %v1100_v46 }
 0x4d0   : > { %1104 = vmax.xlane.f32.xlu0 %v1101_v47 }
 0x559   : > { %v1103_v48 = vpop.xlane.xlu0 %1102 }
 0x55a   : > { %v1106_v59 = vsub.f32 %v1100_v46, %v1103_v48 }
 0x55c   : > { %v1108_v49 = vmul.f32 1.442695, %v1106_v59 }
 0x55d   : > { %v1105_v50 = vpop.xlane.xlu0 %1104 }
 0x55e   : > { %1720 = vpow2.f32 %v1108_v49  ;;  %v1107_v51 = vsub.f32 %v1101_v47, %v1105_v50 }
 0x560   : > { %v1110_v26 = vmul.f32 1.442695, %v1107_v51 }
 0x562   : > { %1722 = vpow2.f32 %v1110_v26 }
 0x568   : > { %v1721_v52 = vpop.eup %1720 }
 0x569   : > { %v1112_v53 = vsel %vm1099_vm2, %v1721_v52, 0.0 }
 0x56a   : > { %1114 = vadd.xlane.f32.xlu1 %v1112_v53 }
 0x56c   : > { %v1723_v36 = vpop.eup %1722 }
 0x56d   : > { %v1113_v54 = vsel %vm1099_vm2, %v1723_v36, 0.0 }
 0x56e   : > { %1116 = vadd.xlane.f32.xlu1 %v1113_v54 }
 0x5f7   : > { %v1115_v55 = vpop.xlane.xlu1 %1114 }
 0x5f8   : > { %1724 = vlog2.f32 %v1115_v55 }
 0x5fb   : > { %v1117_v56 = vpop.xlane.xlu1 %1116 }
 0x5fc   : > { %1726 = vlog2.f32 %v1117_v56 }
 0x602   : > { %v1725_v28 = vpop.eup %1724 }
 0x603   : > { %v1119_v57 = vmul.f32 0.6931472, %v1725_v28 }
 0x605   : > { %v1122_v58 = vsub.f32 %v1106_v59, %v1119_v57 }
 0x606   : > { %v1727_v60 = vpop.eup %1726 }
 0x607   : > { %v1127_v61 = vsel %vm1099_vm2, %v1122_v58, %v1125_v45  ;;  %v1121_v62 = vmul.f32 0.6931472, %v1727_v60 }
 0x608   : > { %1129 = vst [vmem:[%s190_s20] sm:$0xff] %v1127_v61 }
 0x609   : > { %v1123_v63 = vsub.f32 %v1107_v51, %v1121_v62 }
 0x60b   : > { %v1128_v0 = vsel %vm1099_vm2, %v1123_v63, %v1126_v44 }
 0x60c   : > { %1130 = vst [vmem:[%s190_s20 + $0x8] sm:$0xff] %v1128_v0 }
 0x60d PF: > { %s14_s12 = sadd.s32 1, %s1766_s12  }
 0x60e   : > { %p11_p3 = scmp.ge.s32.totalorder %s14_s12, 6  }
 0x610   :  { %13 = sbr.rel (!%p11_p3) target bundleno = 1 (0x1), region = 67 }
 0x617   :  { %1153 = vsyncpa [#allocation3], 1 }
 0x618   :  { %1155 = vsyncpa [#allocation3 + $0x1], 1 }

</bundles_post_ra>
